<compile_context>
chip_gen: v6e
topology: v6e:2x2x1
jax: 0.10.0
libtpu: 0.0.40
codegen_flags: <defaults>
</compile_context>

<pallas_src>
import numpy as np
import jax
import jax.numpy as jnp
from jax.experimental import pallas as pl
from jax.experimental.pallas import tpu as pltpu


# ----------------------------------------------------------------------------
# Fused Pallas kernel (one grid step per batch sample, layout (C, H*W))
# ----------------------------------------------------------------------------

def _s2module_kernel(x_ref, pw0_ref, wbd_ref, pool_ref, up_ref, aff_ref, o_ref):
    c2 = wbd_ref.shape[0]            # C  (= 2 * Ch)
    ch = c2 // 2                     # Ch

    x = x_ref[0]                     # (C, HW)
    aff = aff_ref[...]               # (C, 8) packed per-channel parameters

    pw0_b = aff[:ch, 0:1]            # (Ch, 1) bias of initial pointwise conv
    s1    = aff[:, 1:2]              # folded depthwise*BN1 scale  (C, 1)
    t1    = aff[:, 2:3]              # folded depthwise*BN1 shift  (C, 1)
    a_blk = aff[:, 3:4]              # per-block PReLU slopes      (C, 1)
    b_f   = aff[:, 4:5]              # folded pointwise+BN2 bias   (C, 1)
    a_fin = aff[:, 5:6]              # final PReLU slope           (C, 1)

    # initial pointwise conv (1x1):  (Ch, C) @ (C, HW) + bias
    y = jnp.dot(pw0_ref[...], x, preferred_element_type=jnp.float32) + pw0_b

    # AvgPool2d(reduce_ratio), shared by both S2Blocks:  (Ch, HW) @ (HW, HWs)
    p = jnp.dot(y, pool_ref[...], preferred_element_type=jnp.float32)   # (Ch, HWs)

    # per-block depthwise-1x1 + BatchNorm (single folded affine) + PReLU
    z1 = p * s1[:ch] + t1[:ch]
    z1 = jnp.where(z1 >= 0.0, z1, a_blk[:ch] * z1)
    z2 = p * s1[ch:] + t1[ch:]
    z2 = jnp.where(z2 >= 0.0, z2, a_blk[ch:] * z2)

    # per-block pointwise conv with BN2 pre-folded.  The two column halves of
    # the block-diagonal weight place block1 in output rows [:Ch] and block2
    # in rows [Ch:], i.e. the channel concat is produced directly.
    wbd = wbd_ref[...]                                        # (C, C)
    q = (jnp.dot(wbd[:, :ch], z1, preferred_element_type=jnp.float32)
         + jnp.dot(wbd[:, ch:], z2, preferred_element_type=jnp.float32)
         + b_f)                                               # (C, HWs)

    # UpsamplingBilinear2d(align_corners=True):  (C, HWs) @ (HWs, HW)
    up = jnp.dot(q, up_ref[...], preferred_element_type=jnp.float32)    # (C, HW)

    # residual add + final PReLU
    s = x + up
    o_ref[0] = jnp.where(s >= 0.0, s, a_fin * s)


# ----------------------------------------------------------------------------
# pallas_call wrapper (the only "glue" is a contiguous NCHW->(N,C,HW) reshape)
# ----------------------------------------------------------------------------

def s2module_forward(x_nchw, kernel_ops):
    pw0_wT, wbd, poolT, upT, aff = kernel_ops
    N, C, H, W = x_nchw.shape
    HW = H * W
    HWs = poolT.shape[1]
    Ch = C // 2

    x3 = x_nchw.reshape(N, C, HW)    # contiguous, no transpose needed

    out = pl.pallas_call(
        _s2module_kernel,
        out_shape=jax.ShapeDtypeStruct((N, C, HW), jnp.float32),
        grid=(N,),
        in_specs=[
            pl.BlockSpec((1, C, HW), lambda n: (n, 0, 0)),   # x (per sample)
            pl.BlockSpec((Ch, C),    lambda n: (0, 0)),      # initial pw weight^T
            pl.BlockSpec((C, C),     lambda n: (0, 0)),      # block-diag pw (BN2 folded)
            pl.BlockSpec((HW, HWs),  lambda n: (0, 0)),      # pooling matrix^T
            pl.BlockSpec((HWs, HW),  lambda n: (0, 0)),      # upsample matrix^T
            pl.BlockSpec((C, 8),     lambda n: (0, 0)),      # packed per-channel params
        ],
        out_specs=pl.BlockSpec((1, C, HW), lambda n: (n, 0, 0)),
        compiler_params=pltpu.CompilerParams(
            dimension_semantics=("parallel",),               # batch is independent
            vmem_limit_bytes=32 * 1024 * 1024,
        ),
    )(x3, pw0_wT, wbd, poolT, upT, aff)

    return out.reshape(N, C, H, W)


# ----------------------------------------------------------------------------
# Resampling-matrix construction (exact AvgPool2d / bilinear align_corners)
# ----------------------------------------------------------------------------

def avgpool_matrix(size, r):
    out = size // r
    m = np.zeros((out, size), np.float32)
    for i in range(out):
        m[i, i * r:(i + 1) * r] = 1.0 / r
    return m


def upsample_bilinear_matrix(in_size, r):
    # nn.UpsamplingBilinear2d -> align_corners=True
    out_size = in_size * r
    m = np.zeros((out_size, in_size), np.float32)
    if in_size == 1:
        m[:, 0] = 1.0
        return m
    scale = (in_size - 1) / (out_size - 1)
    for o in range(out_size):
        src = o * scale
        i0 = int(np.floor(src))
        i1 = min(i0 + 1, in_size - 1)
        f = src - i0
        m[o, i0] += 1.0 - f
        m[o, i1] += f
    return m


def build_resample_matrices(H, W, r):
    assert H % r == 0 and W % r == 0, "H and W must be divisible by reduce_ratio"
    Ph, Pw = avgpool_matrix(H, r), avgpool_matrix(W, r)
    Uh, Uw = upsample_bilinear_matrix(H // r, r), upsample_bilinear_matrix(W // r, r)
    pool_np = np.kron(Ph, Pw)        # (Hs*Ws, H*W)
    up_np = np.kron(Uh, Uw)          # (H*W, Hs*Ws)
    # BN2 is folded through the upsample; valid only because align_corners=True
    # bilinear rows are convex combinations (each row sums to 1).
    assert np.allclose(up_np.sum(axis=1), 1.0, atol=1e-5)
    return jnp.asarray(pool_np), jnp.asarray(up_np), jnp.asarray(Uh), jnp.asarray(Uw)


# ----------------------------------------------------------------------------
# Parameter construction (deterministic, synthetic) and folding / packing
# ----------------------------------------------------------------------------

def init_params(key, C):
    Ch = C // 2
    eps = 1e-5
    keys = jax.random.split(key, 4)

    def bn_eval_affine(n):
        gamma, beta = jnp.ones((n,)), jnp.zeros((n,))
        rmean, rvar = jnp.zeros((n,)), jnp.ones((n,))
        scale = gamma / jnp.sqrt(rvar + eps)
        shift = beta - rmean * scale
        return scale.reshape(1, n), shift.reshape(1, n)

    def block_params(k):
        k1, k2, k3, k4 = jax.random.split(k, 4)
        bn1_s, bn1_b = bn_eval_affine(Ch)
        bn2_s, bn2_b = bn_eval_affine(Ch)
        return {
            "dw_w": 0.3 * jax.random.normal(k1, (1, Ch), jnp.float32),   # depthwise 1x1 (groups=Ch)
            "dw_b": 0.1 * jax.random.normal(k2, (1, Ch), jnp.float32),
            "bn1_s": bn1_s, "bn1_b": bn1_b,
            "prelu_a": jnp.full((1, 1), 0.25, jnp.float32),              # nn.PReLU default init
            "pw_w": 0.3 * jax.random.normal(k3, (Ch, Ch), jnp.float32),  # (Cin, Cout)
            "pw_b": 0.1 * jax.random.normal(k4, (1, Ch), jnp.float32),
            "bn2_s": bn2_s, "bn2_b": bn2_b,
        }

    return {
        "pw_w": 0.3 * jax.random.normal(keys[0], (C, Ch), jnp.float32),
        "pw_b": 0.1 * jax.random.normal(keys[1], (1, Ch), jnp.float32),
        "prelu_a": jnp.full((1, 1), 0.25, jnp.float32),
        "block1": block_params(keys[2]),
        "block2": block_params(keys[3]),
    }


def pack_kernel_operands(params, pool_mat, up_mat):
    """Fold affines (dw*bn1, bn2-into-pointwise) and pack kernel operands."""
    C = params["pw_w"].shape[0]
    Ch = C // 2

    def fold_block(p):
        s1 = (p["dw_w"] * p["bn1_s"])[0]                         # (Ch,)
        t1 = (p["dw_b"] * p["bn1_s"] + p["bn1_b"])[0]            # (Ch,)
        s2 = p["bn2_s"][0]
        b2 = p["bn2_b"][0]
        wf = p["pw_w"].T * s2[:, None]                           # (Cout, Cin) with bn2 scale
        bf = p["pw_b"][0] * s2 + b2                              # (Ch,)
        a = jnp.full((Ch,), p["prelu_a"][0, 0], jnp.float32)
        return s1, t1, wf, bf, a

    s1a, t1a, w1, bfa, aa = fold_block(params["block1"])
    s1b, t1b, w2, bfb, ab = fold_block(params["block2"])

    wbd = jnp.zeros((C, C), jnp.float32)
    wbd = wbd.at[:Ch, :Ch].set(w1).at[Ch:, Ch:].set(w2)          # block diagonal

    aff = jnp.zeros((C, 8), jnp.float32)
    aff = aff.at[:Ch, 0].set(params["pw_b"][0])                  # initial pw bias
    aff = aff.at[:, 1].set(jnp.concatenate([s1a, s1b]))
    aff = aff.at[:, 2].set(jnp.concatenate([t1a, t1b]))
    aff = aff.at[:, 3].set(jnp.concatenate([aa, ab]))
    aff = aff.at[:, 4].set(jnp.concatenate([bfa, bfb]))
    aff = aff.at[:, 5].set(jnp.full((C,), params["prelu_a"][0, 0], jnp.float32))

    pw0_wT = params["pw_w"].T                                    # (Ch, C)
    poolT = pool_mat.T                                           # (HW, HWs)
    upT = up_mat.T                                               # (HWs, HW)
    return pw0_wT, wbd, poolT, upT, aff


# ----------------------------------------------------------------------------
# Pure-JAX reference (NCHW, mirrors the PyTorch graph) for validation
# ----------------------------------------------------------------------------

def _s2block_reference(y, p, r, Uh, Uw):
    Nb, Cb, Hh, Ww = y.shape
    pooled = y.reshape(Nb, Cb, Hh // r, r, Ww // r, r).mean(axis=(3, 5))
    z = pooled * p["dw_w"][0][None, :, None, None] + p["dw_b"][0][None, :, None, None]
    z = z * p["bn1_s"][0][None, :, None, None] + p["bn1_b"][0][None, :, None, None]
    a = p["prelu_a"][0, 0]
    z = jnp.where(z >= 0, z, a * z)
    z = jnp.einsum("nchw,co->nohw", z, p["pw_w"]) + p["pw_b"][0][None, :, None, None]
    up = jnp.einsum("Hh,nchw,Ww->ncHW", Uh, z, Uw)
    return up * p["bn2_s"][0][None, :, None, None] + p["bn2_b"][0][None, :, None, None]


def s2module_reference(x, params, r, Uh, Uw):
    y = (jnp.einsum("nchw,co->nohw", x, params["pw_w"])
         + params["pw_b"][0][None, :, None, None])
    y1 = _s2block_reference(y, params["block1"], r, Uh, Uw)
    y2 = _s2block_reference(y, params["block2"], r, Uh, Uw)
    s = x + jnp.concatenate([y1, y2], axis=1)
    a = params["prelu_a"][0, 0]
    return jnp.where(s >= 0, s, a * s)


# ----------------------------------------------------------------------------

if __name__ == "__main__":
    # S2Module config (kernel_size_1/2 unused by the reference module with
    # kernel_per_layer=1; padding must be 0 so residual shapes match).
    N, C, H, W = 2, 16, 16, 16
    reduce_ratio = 2

    key = jax.random.PRNGKey(0)
    kx, kp = jax.random.split(key)
    x = jax.random.normal(kx, (N, C, H, W), jnp.float32)
    params = init_params(kp, C)
    pool_mat, up_mat, Uh, Uw = build_resample_matrices(H, W, reduce_ratio)
    kernel_ops = pack_kernel_operands(params, pool_mat, up_mat)

    fwd = jax.jit(s2module_forward)
    out = jax.block_until_ready(fwd(x, kernel_ops))

    ref = s2module_reference(x, params, reduce_ratio, Uh, Uw)
    assert out.shape == x.shape
    if not np.allclose(np.asarray(out), np.asarray(ref), rtol=1e-2, atol=1e-2):
        raise AssertionError(
            f"Pallas/reference mismatch, max abs err = "
            f"{float(jnp.max(jnp.abs(out - ref)))}")
    print("KERNEL_OK")
</pallas_src>

<mosaic_0001>
module attributes {stable_mosaic.version = 11 : i64} {
  func.func @_s2module_kernel(%arg0: i32, %arg1: memref<1x16x256xf32, #tpu.memory_space<vmem>>, %arg2: memref<8x16xf32, #tpu.memory_space<vmem>>, %arg3: memref<16x16xf32, #tpu.memory_space<vmem>>, %arg4: memref<256x64xf32, #tpu.memory_space<vmem>>, %arg5: memref<64x256xf32, #tpu.memory_space<vmem>>, %arg6: memref<16x8xf32, #tpu.memory_space<vmem>>, %arg7: memref<1x16x256xf32, #tpu.memory_space<vmem>>) attributes {dimension_semantics = [#tpu.dimension_semantics<parallel>], iteration_bounds = array<i64: 2>, scalar_prefetch = 0 : i64, scratch_operands = 0 : i64, tpu.core_type = #tpu.core_type<tc>, window_params = [{transform_indices = @transform_0, window_bounds = array<i64: 1, 16, 256>}, {pipeline_mode = #tpu.pipeline_mode<synchronous>, transform_indices = @transform_1, window_bounds = array<i64: 8, 16>}, {pipeline_mode = #tpu.pipeline_mode<synchronous>, transform_indices = @transform_2, window_bounds = array<i64: 16, 16>}, {pipeline_mode = #tpu.pipeline_mode<synchronous>, transform_indices = @transform_3, window_bounds = array<i64: 256, 64>}, {pipeline_mode = #tpu.pipeline_mode<synchronous>, transform_indices = @transform_4, window_bounds = array<i64: 64, 256>}, {pipeline_mode = #tpu.pipeline_mode<synchronous>, transform_indices = @transform_5, window_bounds = array<i64: 16, 8>}, {transform_indices = @transform_6, window_bounds = array<i64: 1, 16, 256>}]} {
    %c0 = arith.constant 0 : index
    %c0_0 = arith.constant 0 : index
    %c0_1 = arith.constant 0 : index
    %0 = vector.load %arg1[%c0, %c0_0, %c0_1] : memref<1x16x256xf32, #tpu.memory_space<vmem>>, vector<1x16x256xf32>
    %1 = vector.shape_cast %0 : vector<1x16x256xf32> to vector<16x256xf32>
    %c0_2 = arith.constant 0 : index
    %c0_3 = arith.constant 0 : index
    %2 = vector.load %arg6[%c0_2, %c0_3] : memref<16x8xf32, #tpu.memory_space<vmem>>, vector<16x8xf32>
    %3 = vector.extract_strided_slice %2 {offsets = [0, 0], sizes = [8, 1], strides = [1, 1]} : vector<16x8xf32> to vector<8x1xf32>
    %4 = vector.extract_strided_slice %2 {offsets = [0, 1], sizes = [16, 1], strides = [1, 1]} : vector<16x8xf32> to vector<16x1xf32>
    %5 = vector.extract_strided_slice %2 {offsets = [0, 2], sizes = [16, 1], strides = [1, 1]} : vector<16x8xf32> to vector<16x1xf32>
    %6 = vector.extract_strided_slice %2 {offsets = [0, 3], sizes = [16, 1], strides = [1, 1]} : vector<16x8xf32> to vector<16x1xf32>
    %7 = vector.extract_strided_slice %2 {offsets = [0, 4], sizes = [16, 1], strides = [1, 1]} : vector<16x8xf32> to vector<16x1xf32>
    %8 = vector.extract_strided_slice %2 {offsets = [0, 5], sizes = [16, 1], strides = [1, 1]} : vector<16x8xf32> to vector<16x1xf32>
    %c0_4 = arith.constant 0 : index
    %c0_5 = arith.constant 0 : index
    %9 = vector.load %arg2[%c0_4, %c0_5] : memref<8x16xf32, #tpu.memory_space<vmem>>, vector<8x16xf32>
    %cst = arith.constant dense<0.000000e+00> : vector<8x256xf32>
    %10 = tpu.matmul %9, %1, %cst {dimension_numbers = #tpu.dot_dimension_numbers<[1], [0], [0], [1], [0, 0, 1, 1], [], []>} : vector<8x16xf32>, vector<16x256xf32>, vector<8x256xf32> -> vector<8x256xf32>
    %11 = vector.broadcast %3 : vector<8x1xf32> to vector<8x256xf32>
    %12 = arith.addf %10, %11 : vector<8x256xf32>
    %c0_6 = arith.constant 0 : index
    %c0_7 = arith.constant 0 : index
    %13 = vector.load %arg4[%c0_6, %c0_7] : memref<256x64xf32, #tpu.memory_space<vmem>>, vector<256x64xf32>
    %cst_8 = arith.constant dense<0.000000e+00> : vector<8x64xf32>
    %14 = tpu.matmul %12, %13, %cst_8 {dimension_numbers = #tpu.dot_dimension_numbers<[1], [0], [0], [1], [0, 0, 1, 1], [], []>} : vector<8x256xf32>, vector<256x64xf32>, vector<8x64xf32> -> vector<8x64xf32>
    %15 = vector.extract_strided_slice %4 {offsets = [0, 0], sizes = [8, 1], strides = [1, 1]} : vector<16x1xf32> to vector<8x1xf32>
    %16 = vector.broadcast %15 : vector<8x1xf32> to vector<8x64xf32>
    %17 = arith.mulf %14, %16 : vector<8x64xf32>
    %18 = vector.extract_strided_slice %5 {offsets = [0, 0], sizes = [8, 1], strides = [1, 1]} : vector<16x1xf32> to vector<8x1xf32>
    %19 = vector.broadcast %18 : vector<8x1xf32> to vector<8x64xf32>
    %20 = arith.addf %17, %19 : vector<8x64xf32>
    %cst_9 = arith.constant 0.000000e+00 : f32
    %21 = vector.broadcast %cst_9 : f32 to vector<8x64xf32>
    %22 = arith.cmpf oge, %20, %21 : vector<8x64xf32>
    %23 = vector.extract_strided_slice %6 {offsets = [0, 0], sizes = [8, 1], strides = [1, 1]} : vector<16x1xf32> to vector<8x1xf32>
    %24 = vector.broadcast %23 : vector<8x1xf32> to vector<8x64xf32>
    %25 = arith.mulf %24, %20 : vector<8x64xf32>
    %26 = arith.select %22, %20, %25 : vector<8x64xi1>, vector<8x64xf32>
    %27 = vector.extract_strided_slice %4 {offsets = [8, 0], sizes = [8, 1], strides = [1, 1]} : vector<16x1xf32> to vector<8x1xf32>
    %28 = vector.broadcast %27 : vector<8x1xf32> to vector<8x64xf32>
    %29 = arith.mulf %14, %28 : vector<8x64xf32>
    %30 = vector.extract_strided_slice %5 {offsets = [8, 0], sizes = [8, 1], strides = [1, 1]} : vector<16x1xf32> to vector<8x1xf32>
    %31 = vector.broadcast %30 : vector<8x1xf32> to vector<8x64xf32>
    %32 = arith.addf %29, %31 : vector<8x64xf32>
    %cst_10 = arith.constant 0.000000e+00 : f32
    %33 = vector.broadcast %cst_10 : f32 to vector<8x64xf32>
    %34 = arith.cmpf oge, %32, %33 : vector<8x64xf32>
    %35 = vector.extract_strided_slice %6 {offsets = [8, 0], sizes = [8, 1], strides = [1, 1]} : vector<16x1xf32> to vector<8x1xf32>
    %36 = vector.broadcast %35 : vector<8x1xf32> to vector<8x64xf32>
    %37 = arith.mulf %36, %32 : vector<8x64xf32>
    %38 = arith.select %34, %32, %37 : vector<8x64xi1>, vector<8x64xf32>
    %c0_11 = arith.constant 0 : index
    %c0_12 = arith.constant 0 : index
    %39 = vector.load %arg3[%c0_11, %c0_12] : memref<16x16xf32, #tpu.memory_space<vmem>>, vector<16x16xf32>
    %40 = vector.extract_strided_slice %39 {offsets = [0, 0], sizes = [16, 8], strides = [1, 1]} : vector<16x16xf32> to vector<16x8xf32>
    %cst_13 = arith.constant dense<0.000000e+00> : vector<16x64xf32>
    %41 = tpu.matmul %40, %26, %cst_13 {dimension_numbers = #tpu.dot_dimension_numbers<[1], [0], [0], [1], [0, 0, 1, 1], [], []>} : vector<16x8xf32>, vector<8x64xf32>, vector<16x64xf32> -> vector<16x64xf32>
    %42 = vector.extract_strided_slice %39 {offsets = [0, 8], sizes = [16, 8], strides = [1, 1]} : vector<16x16xf32> to vector<16x8xf32>
    %cst_14 = arith.constant dense<0.000000e+00> : vector<16x64xf32>
    %43 = tpu.matmul %42, %38, %cst_14 {dimension_numbers = #tpu.dot_dimension_numbers<[1], [0], [0], [1], [0, 0, 1, 1], [], []>} : vector<16x8xf32>, vector<8x64xf32>, vector<16x64xf32> -> vector<16x64xf32>
    %44 = arith.addf %41, %43 : vector<16x64xf32>
    %45 = vector.broadcast %7 : vector<16x1xf32> to vector<16x64xf32>
    %46 = arith.addf %44, %45 : vector<16x64xf32>
    %c0_15 = arith.constant 0 : index
    %c0_16 = arith.constant 0 : index
    %47 = vector.load %arg5[%c0_15, %c0_16] : memref<64x256xf32, #tpu.memory_space<vmem>>, vector<64x256xf32>
    %cst_17 = arith.constant dense<0.000000e+00> : vector<16x256xf32>
    %48 = tpu.matmul %46, %47, %cst_17 {dimension_numbers = #tpu.dot_dimension_numbers<[1], [0], [0], [1], [0, 0, 1, 1], [], []>} : vector<16x64xf32>, vector<64x256xf32>, vector<16x256xf32> -> vector<16x256xf32>
    %49 = arith.addf %1, %48 : vector<16x256xf32>
    %cst_18 = arith.constant 0.000000e+00 : f32
    %50 = vector.broadcast %cst_18 : f32 to vector<16x256xf32>
    %51 = arith.cmpf oge, %49, %50 : vector<16x256xf32>
    %52 = vector.broadcast %8 : vector<16x1xf32> to vector<16x256xf32>
    %53 = arith.mulf %52, %49 : vector<16x256xf32>
    %54 = arith.select %51, %49, %53 : vector<16x256xi1>, vector<16x256xf32>
    %c0_19 = arith.constant 0 : index
    %c0_20 = arith.constant 0 : index
    %c0_21 = arith.constant 0 : index
    %55 = vector.load %arg7[%c0_19, %c0_20, %c0_21] : memref<1x16x256xf32, #tpu.memory_space<vmem>>, vector<1x16x256xf32>
    %56 = vector.shape_cast %55 : vector<1x16x256xf32> to vector<16x256xf32>
    %57 = vector.shape_cast %54 : vector<16x256xf32> to vector<1x16x256xf32>
    tpu.vector_store %arg7[%c0_19, %c0_20, %c0_21], %57 {strides = array<i32>} : memref<1x16x256xf32, #tpu.memory_space<vmem>>, vector<1x16x256xf32>,
    return
  }
  func.func @transform_0(%arg0: i32) -> (i32, i32, i32) {
    %c0_i32 = arith.constant 0 : i32
    %c0_i32_0 = arith.constant 0 : i32
    %c0_i32_1 = arith.constant 0 : i32
    return %arg0, %c0_i32, %c0_i32_0 : i32, i32, i32
  }
  func.func @transform_1(%arg0: i32) -> (i32, i32) {
    %c0_i32 = arith.constant 0 : i32
    %c0_i32_0 = arith.constant 0 : i32
    %c0_i32_1 = arith.constant 0 : i32
    return %c0_i32, %c0_i32_0 : i32, i32
  }
  func.func @transform_2(%arg0: i32) -> (i32, i32) {
    %c0_i32 = arith.constant 0 : i32
    %c0_i32_0 = arith.constant 0 : i32
    %c0_i32_1 = arith.constant 0 : i32
    return %c0_i32, %c0_i32_0 : i32, i32
  }
  func.func @transform_3(%arg0: i32) -> (i32, i32) {
    %c0_i32 = arith.constant 0 : i32
    %c0_i32_0 = arith.constant 0 : i32
    %c0_i32_1 = arith.constant 0 : i32
    return %c0_i32, %c0_i32_0 : i32, i32
  }
  func.func @transform_4(%arg0: i32) -> (i32, i32) {
    %c0_i32 = arith.constant 0 : i32
    %c0_i32_0 = arith.constant 0 : i32
    %c0_i32_1 = arith.constant 0 : i32
    return %c0_i32, %c0_i32_0 : i32, i32
  }
  func.func @transform_5(%arg0: i32) -> (i32, i32) {
    %c0_i32 = arith.constant 0 : i32
    %c0_i32_0 = arith.constant 0 : i32
    %c0_i32_1 = arith.constant 0 : i32
    return %c0_i32, %c0_i32_0 : i32, i32
  }
  func.func @transform_6(%arg0: i32) -> (i32, i32, i32) {
    %c0_i32 = arith.constant 0 : i32
    %c0_i32_0 = arith.constant 0 : i32
    %c0_i32_1 = arith.constant 0 : i32
    return %arg0, %c0_i32, %c0_i32_0 : i32, i32, i32
  }
}

</mosaic_0001>

<bundles_post_ra>
// kernel: s2module_forward.1
= control target key start
LH: loop header
LB: loop body
LE: loop exit
PB: predicated region body
PF: predicated region fallthrough
CT: control target
= control target key end

     0   :  { %s984_s21 = smov 0   ;;  %s1205_s0 = inlined_call_operand.vmem [shape: f32[2,16,256], index: 0, kind: input, shape index: {}]   ;;  %s1206_s1 = inlined_call_operand.vmem [shape: f32[8,16], index: 1, kind: input, shape index: {}]   ;;  %s1207_s2 = inlined_call_operand.vmem [shape: f32[16,16], index: 2, kind: input, shape index: {}]   ;;  %s1208_s3 = inlined_call_operand.vmem [shape: f32[256,64], index: 3, kind: input, shape index: {}]   ;;  %s1209_s4 = inlined_call_operand.vmem [shape: f32[64,256], index: 4, kind: input, shape index: {}]   ;;  %s1210_s5 = inlined_call_operand.vmem [shape: f32[16,8], index: 5, kind: input, shape index: {}]   ;;  %s1211_s6 = inlined_call_operand.vmem [shape: f32[2,16,256], index: 6, kind: output, shape index: {}]  }
   0x1 LB: > { %s836_s22 = sadd.s32 4294967295, %s939_s21   ;;  %p840_p0 = scmp.ge.s32.totalorder %s939_s21, 1  ;;  %s939_s21 = sphi %s984_s21, %s16_s21  }
   0x2   : > { %p212_p1 = scmp.lt.s32.totalorder %s939_s21, 3 }
   0x4   : > { %p213_p2 = pnand %p840_p0, %p212_p1 }
   0x5   : > { %p242_p3 = scmp.lt.s32.totalorder (!%p213_p2), %s836_s22, 1  ;;  %s946_s12 = smov (!%p213_p2), 120  }
   0x6   : > { %216 = sbr.rel (%p213_p2) target bundleno = 831 (0x33f), region = 44 }
   0xb   : > { %v995_v0 = vld [vmem:[%s1210_s5] sm:$0xff]  ;;  %v941_v1 = vmov 0.0   ;;  %v942_v2 = vmov 0   ;;  %v370_v3 = vld [vmem:[%s1208_s3 + $0xf8] sm:$0xff]  ;;  %v369_v5 = vld [vmem:[%s1208_s3 + $0xf0] sm:$0xff]  ;;  %s1213_s22 = smov (!%p242_p3, %s836_s22), 1 }
   0xc   : > { %332 = vmatprep.mubr.f32.mxu0 %v941_v1  ;;  %923 = vset.pattern.permute.xlu0 %v942_v2  ;;  %v354_v4 = vld [vmem:[%s1208_s3 + $0x78] sm:$0xff]  ;;  %v353_v6 = vld [vmem:[%s1208_s3 + $0x70] sm:$0xff]  ;;  %v368_v7 = vld [vmem:[%s1208_s3 + $0xe8] sm:$0xff]  ;;  %s854_s11 = sshll.u32 %s1213_s22, 5  ;;  %vm264_vm0 = vcmask 130048   ;;  %v943_v41 = vmov 2  }
   0xd   : > { %261 = vperm.xlu0 %923, %v995_v0   ;;  %856 = vmatprep.subr.mxu1 %v370_v3  ;;  %v352_v8 = vld [vmem:[%s1208_s3 + $0x68] sm:$0xff]  ;;  %s246_s16 = scalar_lea.vmem %s1205_s0, %s854_s11  ;;  %v367_v9 = vld [vmem:[%s1208_s3 + $0xe0] sm:$0xff]  ;;  %v366_v15 = vld [vmem:[%s1208_s3 + $0xd8] sm:$0xff]  ;;  %v944_v42 = vmov 1   ;;  %v945_v44 = vmov 3   ;;  %vm484_vm1 = vcmask 64512   ;;  %s251_s30 = scalar_lea.vmem %s1211_s6, %s854_s11 }
   0xe   : > { %857 = vmatpush3.msra.mxu1 %v354_v4  ;;  %v351_v10 = vld [vmem:[%s1208_s3 + $0x60] sm:$0xff]  ;;  %v1031_v11 = vld [vmem:[%s246_s16 + $0x18] sm:$0xff]  ;;  %v1033_v12 = vld [vmem:[%s246_s16 + $0x10] sm:$0xff]  ;;  %925 = vset.pattern.permute.xlu1 %v943_v41  ;;  %v947_v56 = vmov 4   ;;  %vm669_vm4 = vcmask 523264  }
   0xf   : > { %858 = vmatprep.subr.mxu1 %v369_v5  ;;  %v1035_v13 = vld [vmem:[%s246_s16 + $0x8] sm:$0xff]  ;;  %296 = vmatprep.subr.mxu0 %v1031_v11  ;;  %v1038_v14 = vld [vmem:[%s246_s16] sm:$0xff]  ;;  %v350_v17 = vld [vmem:[%s1208_s3 + $0x58] sm:$0xff] }
  0x10   : > { %859 = vmatpush3.msra.mxu1 %v353_v6  ;;  %297 = vmatpush1.msra.mxu0 %v1033_v12  ;;  %v258_v16 = vld [vmem:[%s1206_s1] sm:$0xff]  ;;  %v365_v18 = vld [vmem:[%s1208_s3 + $0xd0] sm:$0xff]  ;;  %v364_v20 = vld [vmem:[%s1208_s3 + $0xc8] sm:$0xff] }
  0x11   : > { %860 = vmatprep.subr.mxu1 %v368_v7  ;;  %298 = vmatprep.subr.mxu0 %v1035_v13  ;;  %v349_v19 = vld [vmem:[%s1208_s3 + $0x50] sm:$0xff]  ;;  %v348_v21 = vld [vmem:[%s1208_s3 + $0x48] sm:$0xff]  ;;  %v363_v22 = vld [vmem:[%s1208_s3 + $0xc0] sm:$0xff] }
  0x12   : > { %861 = vmatpush3.msra.mxu1 %v352_v8  ;;  %299 = vmatpush1.msra.mxu0 %v1038_v14  ;;  %v347_v23 = vld [vmem:[%s1208_s3 + $0x40] sm:$0xff]  ;;  %v362_v24 = vld [vmem:[%s1208_s3 + $0xb8] sm:$0xff]  ;;  %v361_v26 = vld [vmem:[%s1208_s3 + $0xb0] sm:$0xff] }
  0x13   : > { %862 = vmatprep.subr.mxu1 %v367_v9  ;;  %845 = vmatmul.mubr.msk.f32.vlgmr.msra.gmra.mxu0 %vm264_vm0, %v258_v16  ;;  %v346_v25 = vld [vmem:[%s1208_s3 + $0x38] sm:$0xff]  ;;  %v345_v27 = vld [vmem:[%s1208_s3 + $0x30] sm:$0xff]  ;;  %v360_v28 = vld [vmem:[%s1208_s3 + $0xa8] sm:$0xff] }
  0x14   : > { %863 = vmatpush3.msra.mxu1 %v351_v10  ;;  %v344_v29 = vld [vmem:[%s1208_s3 + $0x28] sm:$0xff]  ;;  %v359_v30 = vld [vmem:[%s1208_s3 + $0xa0] sm:$0xff]  ;;  %v358_v32 = vld [vmem:[%s1208_s3 + $0x98] sm:$0xff]  ;;  %924 = vset.pattern.permute.xlu0 %v944_v42 }
  0x15   : > { %864 = vmatprep.subr.mxu1 %v366_v15  ;;  %v343_v31 = vld [vmem:[%s1208_s3 + $0x20] sm:$0xff]  ;;  %v342_v33 = vld [vmem:[%s1208_s3 + $0x18] sm:$0xff]  ;;  %v357_v34 = vld [vmem:[%s1208_s3 + $0x90] sm:$0xff] }
  0x16   : > { %865 = vmatpush3.msra.mxu1 %v350_v17  ;;  %v341_v35 = vld [vmem:[%s1208_s3 + $0x10] sm:$0xff]  ;;  %v356_v36 = vld [vmem:[%s1208_s3 + $0x88] sm:$0xff]  ;;  %v355_v38 = vld [vmem:[%s1208_s3 + $0x80] sm:$0xff] }
  0x17   : > { %866 = vmatprep.subr.mxu1 %v365_v18  ;;  %v340_v37 = vld [vmem:[%s1208_s3 + $0x8] sm:$0xff]  ;;  %v339_v39 = vld [vmem:[%s1208_s3] sm:$0xff]  ;;  %v668_v9 = vld [vmem:[%s1209_s4 + $0x78] sm:$0xff] }
  0x18   : > { %867 = vmatpush3.msra.mxu1 %v349_v19  ;;  %v1121_v40 = vld [vmem:[%s1210_s5 + $0x8] sm:$0xff]  ;;  %v476_v45 = vld [vmem:[%s1207_s2] sm:$0xff]  ;;  %v667_v10 = vld [vmem:[%s1209_s4 + $0x70] sm:$0xff] }
  0x19   : > { %868 = vmatprep.subr.mxu1 %v364_v20  ;;  %465 = vperm.xlu1 %925, %v1121_v40   ;;  %v477_v43 = vld [vmem:[%s1207_s2 + $0x8] sm:$0xff]  ;;  %v665_v16 = vld [vmem:[%s1209_s4 + $0x60] sm:$0xff]  ;;  %v664_v17 = vld [vmem:[%s1209_s4 + $0x58] sm:$0xff] }
  0x1a   : > { %869 = vmatpush3.msra.mxu1 %v348_v21  ;;  %460 = vperm.xlu0 %924, %v1121_v40   ;;  %v666_v15 = vld [vmem:[%s1209_s4 + $0x68] sm:$0xff]  ;;  %v663_v18 = vld [vmem:[%s1209_s4 + $0x50] sm:$0xff]  ;;  %v661_v20 = vld [vmem:[%s1209_s4 + $0x40] sm:$0xff] }
  0x1b   : > { %870 = vmatprep.subr.mxu1 %v363_v22  ;;  %v662_v19 = vld [vmem:[%s1209_s4 + $0x48] sm:$0xff]  ;;  %v660_v21 = vld [vmem:[%s1209_s4 + $0x38] sm:$0xff]  ;;  %v659_v22 = vld [vmem:[%s1209_s4 + $0x30] sm:$0xff] }
  0x1c   : > { %871 = vmatpush3.msra.mxu1 %v347_v23  ;;  %v658_v23 = vld [vmem:[%s1209_s4 + $0x28] sm:$0xff] }
  0x1d   : > { %872 = vmatprep.subr.mxu1 %v362_v24  ;;  %926 = vset.pattern.permute.xlu1 %v944_v42  ;;  %v657_v24 = vld [vmem:[%s1209_s4 + $0x20] sm:$0xff] }
  0x1e   : > { %873 = vmatpush3.msra.mxu1 %v346_v25  ;;  %928 = vset.pattern.permute.xlu0 %v943_v41  ;;  %v656_v25 = vld [vmem:[%s1209_s4 + $0x18] sm:$0xff] }
  0x1f   : > { %874 = vmatprep.subr.mxu1 %v361_v26  ;;  %442 = vperm.xlu1 %926, %v995_v0   ;;  %v655_v26 = vld [vmem:[%s1209_s4 + $0x10] sm:$0xff] }
  0x20   : > { %875 = vmatpush3.msra.mxu1 %v345_v27  ;;  %447 = vperm.xlu0 %928, %v995_v0   ;;  %v654_v27 = vld [vmem:[%s1209_s4 + $0x8] sm:$0xff] }
  0x21   : > { %876 = vmatprep.subr.mxu1 %v360_v28  ;;  %v653_v28 = vld [vmem:[%s1209_s4] sm:$0xff] }
  0x22   : > { %877 = vmatpush3.msra.mxu1 %v344_v29  ;;  %v948_v29 = vmov 5  }
  0x23   : > { %878 = vmatprep.subr.mxu1 %v359_v30  ;;  %927 = vset.pattern.permute.xlu1 %v945_v44 }
  0x24   : > { %879 = vmatpush3.msra.mxu1 %v343_v31  ;;  %482 = vrot.lane.b32.xlu0 %v477_v43, %s946_s12 }
  0x25   : > { %880 = vmatprep.subr.mxu1 %v358_v32  ;;  %471 = vperm.xlu1 %927, %v1121_v40  }
  0x26   : > { %881 = vmatpush3.msra.mxu1 %v342_v33  ;;  %930 = vset.pattern.permute.xlu0 %v947_v56 }
  0x27   : > { %882 = vmatprep.subr.mxu1 %v357_v34 }
  0x28   : > { %883 = vmatpush3.msra.mxu1 %v341_v35  ;;  %648 = vperm.xlu0 %930, %v1121_v40  }
  0x29   : > { %884 = vmatprep.subr.mxu1 %v356_v36  ;;  %453 = vperm.xlu1 %927, %v995_v0  }
  0x2a   : > { %885 = vmatpush3.msra.mxu1 %v340_v37 }
  0x2b   : > { %886 = vmatprep.subr.mxu1 %v355_v38 }
  0x2c   : > { %887 = vmatpush3.msra.mxu1 %v339_v39  ;;  %932 = vset.pattern.permute.xlu0 %v948_v29 }
  0x2d   : > { %480 = vrot.lane.b32.xlu1 %v476_v45, %s946_s12 }
  0x2e   : > { %929 = vset.pattern.permute.xlu1 %v947_v56 }
  0x31   : > { %644 = vperm.xlu1 %929, %v995_v0  }
  0x35   : > { %931 = vset.pattern.permute.xlu1 %v948_v29 }
  0x36   : > { %762 = vperm.xlu1 %931, %v995_v0  }
  0x3a   : > { %766 = vperm.xlu1 %931, %v1121_v40  }
  0x88   : > { %v262_v47 = vpop.permute.xlu0 %261 }
  0x94   : > { %v466_v51 = vpop.permute.xlu1 %465 }
  0x95   : > { %v461_v57 = vpop.permute.xlu0 %460 }
  0x9a   : > { %v443_v52 = vpop.permute.xlu1 %442 }
  0x9b   : > { %v448_v61 = vpop.permute.xlu0 %447 }
  0x9f   : > { %v483_v7 = vpop.permute.xlu0 %482 }
  0xa0   : > { %v472_v53 = vpop.permute.xlu1 %471 }
  0xa3   : > { %v649_v38 = vpop.permute.xlu0 %648 }
  0xa4   : > { %v454_v54 = vpop.permute.xlu1 %453 }
  0xa8   : > { %v481_v55 = vpop.permute.xlu1 %480 }
  0xa9   : > { %899 = vmatprep.mubr.msk.f32.mxu0 %vm484_vm1, %v481_v55 }
  0xac   : > { %v645_v34 = vpop.permute.xlu1 %644 }
  0xb1   : > { %v763_v0 = vpop.permute.xlu1 %762 }
  0xd3   : > { %v334_v46 = vpop.f32.mrf.mxu0 }
  0xd4   : > { %v335_v50 = vadd.f32 %v334_v46, %v262_v47 }
  0xd5   : > { %v336_v48 = vpop.f32.mrf.mxu0 }
  0xd6   : > { %v337_v49 = vadd.f32 %v336_v48, %v262_v47  ;;  %v767_v48 = vpop.permute.xlu1 %766 }
  0xd8   : > { %435 = vmatprep.mubr.f32.mxu1 %v337_v49 }
  0xd9   : > { %436 = vmatmul.mubr.f32.vlgmr.msra.gmra.mxu1 %v335_v50 }
 0x199   : > { %v888_v58 = vpop.f32.mrf.mxu1 }
 0x19b   : > { %v889_v59 = vpop.f32.mrf.mxu1 }
 0x19c   : > { %v890_v60 = vadd.f32 %v889_v59, %v888_v58 }
 0x19e   : > { %v463_v62 = vmul.f32 %v890_v60, %v461_v57  ;;  %v445_v63 = vmul.f32 %v890_v60, %v443_v52 }
 0x1a0   : > { %v468_v2 = vadd.f32 %v466_v51, %v463_v62  ;;  %v450_v3 = vadd.f32 %v448_v61, %v445_v63 }
 0x1a2   : > { %v474_v4 = vmul.f32 %v472_v53, %v468_v2  ;;  %v456_v5 = vmul.f32 %v454_v54, %v450_v3  ;;  %vm469_vm2 = vcmp.ge.f32.partialorder %v468_v2, 0.0  ;;  %vm451_vm3 = vcmp.ge.f32.partialorder %v450_v3, 0.0 }
 0x1a4   : > { %v475_v6 = vsel %vm469_vm2, %v468_v2, %v474_v4  ;;  %v457_v8 = vsel %vm451_vm3, %v450_v3, %v456_v5 }
 0x1a5   : > { %897 = vmatprep.subr.mxu0 %v475_v6 }
 0x1a6   : > { %898 = vmatpush3.msra.mxu0 %v475_v6 }
 0x1a7   : > { %900 = vmatmul.mubr.msk.f32.vlgmr.msra.gmra.mxu0 %vm484_vm1, %v483_v7  ;;  %902 = vmatprep.subr.mxu0 %v457_v8 }
 0x1a8   : > { %903 = vmatpush3.msra.mxu0 %v457_v8  ;;  %904 = vmatprep.mubr.msk.f32.mxu0 %vm484_vm1, %v476_v45 }
 0x1a9   : > { %692 = vmatprep.subr.mxu0 %v668_v9 }
 0x1ab   : > { %905 = vmatmul.mubr.msk.f32.vlgmr.msra.gmra.mxu0 %vm484_vm1, %v477_v43 }
 0x1ac   : > { %693 = vmatpush1.msra.mxu0 %v667_v10  ;;  %740 = vmatprep.mubr.f32.mxu0 %v941_v1 }
 0x1ad   : > { %694 = vmatprep.subr.mxu0 %v666_v15 }
 0x1ae   : > { %695 = vmatpush1.msra.mxu0 %v665_v16 }
 0x1af   : > { %696 = vmatprep.subr.mxu0 %v664_v17 }
 0x1b0   : > { %697 = vmatpush1.msra.mxu0 %v663_v18 }
 0x1b1   : > { %698 = vmatprep.subr.mxu0 %v662_v19 }
 0x1b2   : > { %699 = vmatpush1.msra.mxu0 %v661_v20 }
 0x1b3   : > { %700 = vmatprep.subr.mxu0 %v660_v21 }
 0x1b4   : > { %701 = vmatpush1.msra.mxu0 %v659_v22 }
 0x1b5   : > { %702 = vmatprep.subr.mxu0 %v658_v23 }
 0x1b6   : > { %703 = vmatpush1.msra.mxu0 %v657_v24 }
 0x1b7   : > { %704 = vmatprep.subr.mxu0 %v656_v25 }
 0x1b8   : > { %705 = vmatpush1.msra.mxu0 %v655_v26 }
 0x1b9   : > { %706 = vmatprep.subr.mxu0 %v654_v27 }
 0x1ba   : > { %707 = vmatpush1.msra.mxu0 %v653_v28 }
 0x267   : > { %v901_v30 = vpop.f32.mrf.mxu0 }
 0x269   : > { %v555_v31 = vpop.f32.mrf.mxu0 }
 0x26b   : > { %v906_v32 = vpop.f32.mrf.mxu0 }
 0x26c   : > { %v640_v36 = vadd.f32 %v906_v32, %v901_v30 }
 0x26d   : > { %v634_v33 = vpop.f32.mrf.mxu0 }
 0x26e   : > { %v635_v35 = vadd.f32 %v634_v33, %v555_v31  ;;  %v652_v39 = vadd.f32 %v649_v38, %v640_v36 }
 0x270   : > { %v651_v37 = vadd.f32 %v645_v34, %v635_v35 }
 0x272   : > { %850 = vmatmul.mubr.msk.f32.vlgmr.msra.gmra.mxu0 %vm669_vm4, %v651_v37 }
 0x273   : > { %746 = vmatprep.mubr.f32.mxu0 %v941_v1 }
 0x276   : > { %851 = vmatmul.mubr.msk.f32.gmra.mxu0 %vm669_vm4, %v652_v39 }
 0x332   : > { %v742_v41 = vpop.f32.mrf.mxu0 }
 0x333   : > { %v753_v40 = vadd.f32 %v742_v41, %v1038_v14 }
 0x334   : > { %v744_v42 = vpop.f32.mrf.mxu0 }
 0x335   : > { %vm757_vm5 = vcmp.ge.f32.partialorder %v753_v40, 0.0  ;;  %v769_v43 = vmul.f32 %v763_v0, %v753_v40  ;;  %v754_v44 = vadd.f32 %v744_v42, %v1035_v13 }
 0x336   : > { %v748_v45 = vpop.f32.mrf.mxu0 }
 0x337   : > { %v773_v46 = vsel %vm757_vm5, %v753_v40, %v769_v43  ;;  %vm758_vm6 = vcmp.ge.f32.partialorder %v754_v44, 0.0  ;;  %v770_v1 = vmul.f32 %v763_v0, %v754_v44  ;;  %v755_v47 = vadd.f32 %v748_v45, %v1033_v12 }
 0x338   : > { %777 = vst [vmem:[%s251_s30] sm:$0xff] %v773_v46  ;;  %v750_v49 = vpop.f32.mrf.mxu0 }
 0x339   : > { %v774_v14 = vsel %vm758_vm6, %v754_v44, %v770_v1  ;;  %vm759_vm7 = vcmp.ge.f32.partialorder %v755_v47, 0.0  ;;  %v771_v50 = vmul.f32 %v767_v48, %v755_v47  ;;  %v756_v51 = vadd.f32 %v750_v49, %v1031_v11 }
 0x33a   : > { %778 = vst [vmem:[%s251_s30 + $0x8] sm:$0xff] %v774_v14 }
 0x33b   : > { %v775_v52 = vsel %vm759_vm7, %v755_v47, %v771_v50  ;;  %vm760_vm8 = vcmp.ge.f32.partialorder %v756_v51, 0.0  ;;  %v772_v53 = vmul.f32 %v767_v48, %v756_v51 }
 0x33c   : > { %779 = vst [vmem:[%s251_s30 + $0x10] sm:$0xff] %v775_v52 }
 0x33d   : > { %v776_v13 = vsel %vm760_vm8, %v756_v51, %v772_v53 }
 0x33e   : > { %780 = vst [vmem:[%s251_s30 + $0x18] sm:$0xff] %v776_v13 }
 0x33f PF: > { %s16_s21 = sadd.s32 1, %s939_s21  }
 0x340   : > { %p13_p4 = scmp.ge.s32.totalorder %s16_s21, 4  }
 0x342   :  { %15 = sbr.rel (!%p13_p4) target bundleno = 1 (0x1), region = 74 }

</bundles_post_ra>
